<compile_context>
chip_gen: v7x
topology: tpu7x:2x2x1
jax: 0.10.0
libtpu: 0.0.40
codegen_flags: <defaults>
</compile_context>

<pallas_src>
import jax
import jax.numpy as jnp
from jax import lax
from jax.experimental import pallas as pl
from jax.experimental.pallas import tpu as pltpu


def mha_flash_kernel(q_ref, k_ref, v_ref, o_ref, m_sc, l_sc, acc_sc):
    """One (batch, q_tile) output block, reduced over kv tiles (grid axis 2).

    q_ref  : (H, Tq, D)  pre-projected, pre-scaled queries for this q tile
    k_ref  : (H, Tk, D)  pre-projected keys for this kv tile
    v_ref  : (H, Tk, D)  pre-projected values for this kv tile
    o_ref  : (H, Tq, D)  normalized attention output (written on last kv step)
    m_sc   : (H, Tq, 1)  f32 running max          (last-dim-1: tiny, per review
    l_sc   : (H, Tq, 1)  f32 running denominator    note; kept for clarity)
    acc_sc : (H, Tq, D)  f32 un-normalized attention output
    """
    qi = pl.program_id(1)
    ki = pl.program_id(2)

    H, Tq, D = acc_sc.shape
    Tk = k_ref.shape[1]
    q_start = qi * Tq
    k_start = ki * Tk

    @pl.when(ki == 0)
    def _init():
        m_sc[...] = jnp.full_like(m_sc, -jnp.inf)
        l_sc[...] = jnp.zeros_like(l_sc)
        acc_sc[...] = jnp.zeros_like(acc_sc)

    def flash_step(apply_mask):
        # Batched over heads: (H,Tq,D) x (H,Tk,D) -> (H,Tq,Tk), contraction on
        # the last dims (no materialized .T / relayout).
        s = jnp.einsum('hqd,hkd->hqk', q_ref[...], k_ref[...],
                       preferred_element_type=jnp.float32)
        if apply_mask:  # static Python bool: only the diagonal path traces this
            row = q_start + lax.broadcasted_iota(jnp.int32, (Tq, Tk), 0)
            col = k_start + lax.broadcasted_iota(jnp.int32, (Tq, Tk), 1)
            # Additive mask, built once and shared across heads; finite -1e30
            # keeps fully-masked rows NaN-free.
            s = s + jnp.where(col <= row, jnp.float32(0.0),
                              jnp.float32(-1e30))[None]

        m_prev = m_sc[...]                                          # (H, Tq, 1)
        m_new = jnp.maximum(m_prev, jnp.max(s, axis=-1, keepdims=True))
        alpha = jnp.exp(m_prev - m_new)
        p = jnp.exp(s - m_new)
        l_sc[...] = alpha * l_sc[...] + jnp.sum(p, axis=-1, keepdims=True)

        v = v_ref[...]
        pv = jnp.einsum('hqk,hkd->hqd', p.astype(v.dtype), v,
                        preferred_element_type=jnp.float32)         # (H, Tq, D)
        # Single whole-ref accumulator update per kv step (no per-head slices
        # -> no masked vst.msk partial stores).
        acc_sc[...] = alpha * acc_sc[...] + pv
        m_sc[...] = m_new

    # Fast path: kv tile entirely below the diagonal -> no mask work at all.
    @pl.when(k_start + (Tk - 1) <= q_start)
    def _update_unmasked():
        flash_step(apply_mask=False)

    # Diagonal-crossing tiles need the causal mask.  Strictly-future tiles
    # (k_start > q_start + Tq - 1) are skipped entirely.
    @pl.when(jnp.logical_and(k_start + (Tk - 1) > q_start,
                             k_start <= q_start + (Tq - 1)))
    def _update_masked():
        flash_step(apply_mask=True)

    @pl.when(ki == pl.num_programs(2) - 1)
    def _finalize():
        # Deferred softmax normalization, once per q tile.  approx=False keeps
        # the result bit-close to the module (review correctness note); this
        # runs on only H*Tq elements so the cost is negligible.
        inv = pl.reciprocal(l_sc[...], approx=False)
        o_ref[...] = (acc_sc[...] * inv).astype(o_ref.dtype)


def multi_head_attention(x, wq, wk, wv, wp_t, bp, *, block_q=128, block_k=256,
                         compute_dtype=None):
    """x: (B,T,E); wq/wk/wv: (H,E,D) (x @ W layout); wp_t: (E,E) = W_proj.T; bp: (E,).

    compute_dtype: operand dtype for all matmuls (jnp.bfloat16 recommended on
    TPU: MXU-native, halves DMA/VMEM).  Accumulation is always f32.
    """
    B, T, E = x.shape
    H, _, D = wq.shape
    assert H * D == E, "module requires n_heads * head_size == emb_dim"

    block_q = min(block_q, T)
    block_k = min(block_k, T)
    # TODO(synk): no padding path for ragged T; T must tile evenly.
    assert T % block_q == 0 and T % block_k == 0

    dt = x.dtype if compute_dtype is None else compute_dtype

    # Fold the emb_dim**-0.5 scale (C ** -0.5 with C = emb_dim, exactly as in
    # the PyTorch module) into Wq in f32 BEFORE any low-precision cast.
    scale = jnp.asarray(E, jnp.float32) ** -0.5
    wq_scaled = wq.astype(jnp.float32) * scale

    # Fused QKV projection, done ONCE per token (hoisted out of the flash
    # kernel's kv loop, per review): one lane-dense (B*T, E) x (E, 3E) GEMM.
    w_qkv = jnp.concatenate(
        [wq_scaled.transpose(1, 0, 2).reshape(E, H * D),
         wk.astype(jnp.float32).transpose(1, 0, 2).reshape(E, H * D),
         wv.astype(jnp.float32).transpose(1, 0, 2).reshape(E, H * D)],
        axis=1).astype(dt)                                     # (E, 3*H*D)
    qkv = jnp.einsum('bte,ef->btf', x.astype(dt), w_qkv,
                     preferred_element_type=jnp.float32)       # (B, T, 3*H*D)
    qkv = qkv.astype(dt).reshape(B, T, 3, H, D)
    q = qkv[:, :, 0].transpose(0, 2, 1, 3)                     # (B, H, T, D)
    k = qkv[:, :, 1].transpose(0, 2, 1, 3)
    v = qkv[:, :, 2].transpose(0, 2, 1, 3)

    n_q = T // block_q
    n_k = T // block_k

    attn = pl.pallas_call(
        mha_flash_kernel,
        out_shape=jax.ShapeDtypeStruct((B, H, T, D), dt),
        grid_spec=pltpu.PrefetchScalarGridSpec(
            num_scalar_prefetch=0,
            grid=(B, n_q, n_k),
            in_specs=[
                pl.BlockSpec((None, H, block_q, D),
                             lambda b, qi, ki: (b, 0, qi, 0)),
                pl.BlockSpec((None, H, block_k, D),
                             lambda b, qi, ki: (b, 0, ki, 0)),
                pl.BlockSpec((None, H, block_k, D),
                             lambda b, qi, ki: (b, 0, ki, 0)),
            ],
            out_specs=pl.BlockSpec((None, H, block_q, D),
                                   lambda b, qi, ki: (b, 0, qi, 0)),
            scratch_shapes=[
                pltpu.VMEM((H, block_q, 1), jnp.float32),   # m_sc
                pltpu.VMEM((H, block_q, 1), jnp.float32),   # l_sc
                pltpu.VMEM((H, block_q, D), jnp.float32),   # acc_sc
            ],
        ),
        compiler_params=pltpu.CompilerParams(
            # batch / q_tile shard across v7x's 2 TensorCores; kv is reduction.
            dimension_semantics=("parallel", "parallel", "arbitrary"),
            # No weights resident in VMEM -> 48 MiB leaves headroom even on
            # v7x (64 MiB) while allowing larger tile sweeps on v5e/v6e.
            vmem_limit_bytes=48 * 1024 * 1024),
    )(q, k, v)

    # Output projection (+ bias), hoisted out of the kernel (per review): one
    # lane-dense (B*T, E) x (E, E) GEMM; keeps wp out of VMEM on v7x and fuses
    # the (B,H,T,D)->(B,T,E) relayout into XLA.
    attn_flat = attn.transpose(0, 2, 1, 3).reshape(B, T, E)
    out = jnp.einsum('bte,ef->btf', attn_flat, wp_t.astype(dt),
                     preferred_element_type=jnp.float32) + bp.astype(jnp.float32)
    # TODO(synk): output dropout is identity (eval mode).
    return out.astype(x.dtype)


def mha_reference(x, wq, wk, wv, wp_t, bp):
    """Pure-JAX reference with the module's exact (eval-mode) semantics."""
    B, T, E = x.shape
    H = wq.shape[0]
    scale = E ** -0.5
    causal = jnp.tril(jnp.ones((T, T), dtype=bool))
    outs = []
    for h in range(H):
        q = x @ wq[h]
        k = x @ wk[h]
        v = x @ wv[h]
        s = (q @ jnp.swapaxes(k, -1, -2)) * scale
        s = jnp.where(causal, s, -jnp.inf)
        p = jax.nn.softmax(s, axis=-1)
        outs.append(p @ v)
    cat = jnp.concatenate(outs, axis=-1)
    return cat @ wp_t + bp.reshape(1, E)


if __name__ == "__main__":
    # Small GPT-ish config: emb_dim = n_heads * head_size.  T=16 with 8-row
    # tiles exercises all three flash paths: strictly-future tile skip,
    # unmasked below-diagonal fast path, and masked diagonal tiles.
    B, T = 2, 16
    n_heads, head_size = 4, 8
    emb_dim = n_heads * head_size      # 32

    key = jax.random.PRNGKey(0)
    k_x, k_q, k_k, k_v, k_p, k_b = jax.random.split(key, 6)

    x = jax.random.normal(k_x, (B, T, emb_dim), dtype=jnp.float32)

    # PyTorch nn.Linear weight convention: (out_features, in_features) = (D, E).
    wq_torch = 0.1 * jax.random.normal(k_q, (n_heads, head_size, emb_dim), jnp.float32)
    wk_torch = 0.1 * jax.random.normal(k_k, (n_heads, head_size, emb_dim), jnp.float32)
    wv_torch = 0.1 * jax.random.normal(k_v, (n_heads, head_size, emb_dim), jnp.float32)
    wp_torch = 0.1 * jax.random.normal(k_p, (emb_dim, emb_dim), jnp.float32)
    bp_torch = 0.1 * jax.random.normal(k_b, (emb_dim,), jnp.float32)

    # Transpose to the x @ W layout.
    wq = jnp.swapaxes(wq_torch, -1, -2)    # (H, E, D)
    wk = jnp.swapaxes(wk_torch, -1, -2)
    wv = jnp.swapaxes(wv_torch, -1, -2)
    wp_t = wp_torch.T                      # (E, E)
    bp = bp_torch                          # (E,)

    ref = mha_reference(x, wq, wk, wv, wp_t, bp)

    # f32 operands: tight check against the pure-JAX reference.
    out = multi_head_attention(x, wq, wk, wv, wp_t, bp, block_q=8, block_k=8)
    out = jax.block_until_ready(out)
    assert out.shape == (B, T, emb_dim)
    assert jnp.allclose(out, ref, atol=2e-3, rtol=2e-3), "f32 mismatch vs reference"

    # bf16 operands (recommended MXU-native path, per perf review).
    out_bf16 = multi_head_attention(x, wq, wk, wv, wp_t, bp, block_q=8, block_k=8,
                                    compute_dtype=jnp.bfloat16)
    out_bf16 = jax.block_until_ready(out_bf16)
    assert jnp.allclose(out_bf16, ref, atol=5e-2, rtol=5e-2), "bf16 mismatch vs reference"

    print("KERNEL_OK")
</pallas_src>

<mosaic_0001>
module attributes {stable_mosaic.version = 11 : i64} {
  func.func @mha_flash_kernel(%arg0: i32, %arg1: i32, %arg2: i32, %arg3: memref<1x4x8x8xf32, #tpu.memory_space<vmem>>, %arg4: memref<1x4x8x8xf32, #tpu.memory_space<vmem>>, %arg5: memref<1x4x8x8xf32, #tpu.memory_space<vmem>>, %arg6: memref<1x4x8x8xf32, #tpu.memory_space<vmem>>, %arg7: memref<4x8x1xf32, #tpu.memory_space<vmem>>, %arg8: memref<4x8x1xf32, #tpu.memory_space<vmem>>, %arg9: memref<4x8x8xf32, #tpu.memory_space<vmem>>) attributes {dimension_semantics = [#tpu.dimension_semantics<parallel>, #tpu.dimension_semantics<parallel>, #tpu.dimension_semantics<arbitrary>], iteration_bounds = array<i64: 2, 2, 2>, scalar_prefetch = 0 : i64, scratch_operands = 3 : i64, tpu.core_type = #tpu.core_type<tc>, window_params = [{transform_indices = @transform_0, window_bounds = array<i64: 1, 4, 8, 8>}, {transform_indices = @transform_1, window_bounds = array<i64: 1, 4, 8, 8>}, {transform_indices = @transform_2, window_bounds = array<i64: 1, 4, 8, 8>}, {transform_indices = @transform_3, window_bounds = array<i64: 1, 4, 8, 8>}]} {
    %c8_i32 = arith.constant 8 : i32
    %0 = arith.muli %arg1, %c8_i32 : i32
    %c8_i32_0 = arith.constant 8 : i32
    %1 = arith.muli %arg2, %c8_i32_0 : i32
    %c0_i32 = arith.constant 0 : i32
    %2 = arith.cmpi eq, %arg2, %c0_i32 : i32
    %3 = arith.extui %2 : i1 to i32
    %c0_i32_1 = arith.constant 0 : i32
    %4 = arith.cmpi ne, %3, %c0_i32_1 : i32
    scf.if %4 {
      %cst = arith.constant 0xFF800000 : f32
      %19 = vector.broadcast %cst : f32 to vector<4x8x1xf32>
      %c0 = arith.constant 0 : index
      %c0_7 = arith.constant 0 : index
      %c0_8 = arith.constant 0 : index
      %20 = vector.load %arg7[%c0, %c0_7, %c0_8] : memref<4x8x1xf32, #tpu.memory_space<vmem>>, vector<4x8x1xf32>
      tpu.vector_store %arg7[%c0, %c0_7, %c0_8], %19 {strides = array<i32>} : memref<4x8x1xf32, #tpu.memory_space<vmem>>, vector<4x8x1xf32>,
      %cst_9 = arith.constant 0.000000e+00 : f32
      %21 = vector.broadcast %cst_9 : f32 to vector<4x8x1xf32>
      %c0_10 = arith.constant 0 : index
      %c0_11 = arith.constant 0 : index
      %c0_12 = arith.constant 0 : index
      %22 = vector.load %arg8[%c0_10, %c0_11, %c0_12] : memref<4x8x1xf32, #tpu.memory_space<vmem>>, vector<4x8x1xf32>
      tpu.vector_store %arg8[%c0_10, %c0_11, %c0_12], %21 {strides = array<i32>} : memref<4x8x1xf32, #tpu.memory_space<vmem>>, vector<4x8x1xf32>,
      %cst_13 = arith.constant 0.000000e+00 : f32
      %23 = vector.broadcast %cst_13 : f32 to vector<4x8x8xf32>
      %c0_14 = arith.constant 0 : index
      %c0_15 = arith.constant 0 : index
      %c0_16 = arith.constant 0 : index
      %24 = vector.load %arg9[%c0_14, %c0_15, %c0_16] : memref<4x8x8xf32, #tpu.memory_space<vmem>>, vector<4x8x8xf32>
      tpu.vector_store %arg9[%c0_14, %c0_15, %c0_16], %23 {strides = array<i32>} : memref<4x8x8xf32, #tpu.memory_space<vmem>>, vector<4x8x8xf32>,
    } else {
    }
    %c7_i32 = arith.constant 7 : i32
    %5 = arith.addi %1, %c7_i32 : i32
    %6 = arith.cmpi sle, %5, %0 : i32
    %7 = arith.extui %6 : i1 to i32
    %c0_i32_2 = arith.constant 0 : i32
    %8 = arith.cmpi ne, %7, %c0_i32_2 : i32
    scf.if %8 {
      %c0 = arith.constant 0 : index
      %c0_7 = arith.constant 0 : index
      %c0_8 = arith.constant 0 : index
      %c0_9 = arith.constant 0 : index
      %19 = vector.load %arg3[%c0, %c0_7, %c0_8, %c0_9] : memref<1x4x8x8xf32, #tpu.memory_space<vmem>>, vector<1x4x8x8xf32>
      %20 = vector.shape_cast %19 : vector<1x4x8x8xf32> to vector<4x8x8xf32>
      %c0_10 = arith.constant 0 : index
      %c0_11 = arith.constant 0 : index
      %c0_12 = arith.constant 0 : index
      %c0_13 = arith.constant 0 : index
      %21 = vector.load %arg4[%c0_10, %c0_11, %c0_12, %c0_13] : memref<1x4x8x8xf32, #tpu.memory_space<vmem>>, vector<1x4x8x8xf32>
      %22 = vector.shape_cast %21 : vector<1x4x8x8xf32> to vector<4x8x8xf32>
      "tpu.trace_start"() <{level = 10 : i32, message = "hqd,hkd->hqk"}> : () -> ()
      %cst = arith.constant dense<0.000000e+00> : vector<4x8x8xf32>
      %23 = tpu.matmul %20, %22, %cst {dimension_numbers = #tpu.dot_dimension_numbers<[2], [2], [1], [1], [0, 0, 0, 1, 1, 1], [0], [0]>} : vector<4x8x8xf32>, vector<4x8x8xf32>, vector<4x8x8xf32> -> vector<4x8x8xf32>
      "tpu.trace_stop"() : () -> ()
      %c0_14 = arith.constant 0 : index
      %c0_15 = arith.constant 0 : index
      %c0_16 = arith.constant 0 : index
      %24 = vector.load %arg7[%c0_14, %c0_15, %c0_16] : memref<4x8x1xf32, #tpu.memory_space<vmem>>, vector<4x8x1xf32>
      %cst_17 = arith.constant dense<0xFF800000> : vector<4x8xf32>
      %25 = vector.multi_reduction <maximumf>, %23, %cst_17 [2] : vector<4x8x8xf32> to vector<4x8xf32>
      %26 = vector.shape_cast %25 : vector<4x8xf32> to vector<4x8x1xf32>
      %27 = arith.maximumf %24, %26 : vector<4x8x1xf32>
      %28 = arith.subf %24, %27 : vector<4x8x1xf32>
      %29 = math.exp %28 : vector<4x8x1xf32>
      %30 = vector.broadcast %27 : vector<4x8x1xf32> to vector<4x8x8xf32>
      %31 = arith.subf %23, %30 : vector<4x8x8xf32>
      %32 = math.exp %31 : vector<4x8x8xf32>
      %c0_18 = arith.constant 0 : index
      %c0_19 = arith.constant 0 : index
      %c0_20 = arith.constant 0 : index
      %33 = vector.load %arg8[%c0_18, %c0_19, %c0_20] : memref<4x8x1xf32, #tpu.memory_space<vmem>>, vector<4x8x1xf32>
      %34 = arith.mulf %29, %33 : vector<4x8x1xf32>
      %cst_21 = arith.constant dense<0.000000e+00> : vector<4x8xf32>
      %35 = vector.multi_reduction <add>, %32, %cst_21 [2] : vector<4x8x8xf32> to vector<4x8xf32>
      %36 = vector.shape_cast %35 : vector<4x8xf32> to vector<4x8x1xf32>
      %37 = arith.addf %34, %36 : vector<4x8x1xf32>
      %c0_22 = arith.constant 0 : index
      %c0_23 = arith.constant 0 : index
      %c0_24 = arith.constant 0 : index
      %38 = vector.load %arg8[%c0_22, %c0_23, %c0_24] : memref<4x8x1xf32, #tpu.memory_space<vmem>>, vector<4x8x1xf32>
      tpu.vector_store %arg8[%c0_22, %c0_23, %c0_24], %37 {strides = array<i32>} : memref<4x8x1xf32, #tpu.memory_space<vmem>>, vector<4x8x1xf32>,
      %c0_25 = arith.constant 0 : index
      %c0_26 = arith.constant 0 : index
      %c0_27 = arith.constant 0 : index
      %c0_28 = arith.constant 0 : index
      %39 = vector.load %arg5[%c0_25, %c0_26, %c0_27, %c0_28] : memref<1x4x8x8xf32, #tpu.memory_space<vmem>>, vector<1x4x8x8xf32>
      %40 = vector.shape_cast %39 : vector<1x4x8x8xf32> to vector<4x8x8xf32>
      "tpu.trace_start"() <{level = 10 : i32, message = "hqk,hkd->hqd"}> : () -> ()
      %cst_29 = arith.constant dense<0.000000e+00> : vector<4x8x8xf32>
      %41 = tpu.matmul %32, %40, %cst_29 {dimension_numbers = #tpu.dot_dimension_numbers<[2], [1], [1], [2], [0, 0, 0, 1, 1, 2], [0], [0]>} : vector<4x8x8xf32>, vector<4x8x8xf32>, vector<4x8x8xf32> -> vector<4x8x8xf32>
      "tpu.trace_stop"() : () -> ()
      %c0_30 = arith.constant 0 : index
      %c0_31 = arith.constant 0 : index
      %c0_32 = arith.constant 0 : index
      %42 = vector.load %arg9[%c0_30, %c0_31, %c0_32] : memref<4x8x8xf32, #tpu.memory_space<vmem>>, vector<4x8x8xf32>
      %43 = vector.broadcast %29 : vector<4x8x1xf32> to vector<4x8x8xf32>
      %44 = arith.mulf %43, %42 : vector<4x8x8xf32>
      %45 = arith.addf %44, %41 : vector<4x8x8xf32>
      %c0_33 = arith.constant 0 : index
      %c0_34 = arith.constant 0 : index
      %c0_35 = arith.constant 0 : index
      %46 = vector.load %arg9[%c0_33, %c0_34, %c0_35] : memref<4x8x8xf32, #tpu.memory_space<vmem>>, vector<4x8x8xf32>
      tpu.vector_store %arg9[%c0_33, %c0_34, %c0_35], %45 {strides = array<i32>} : memref<4x8x8xf32, #tpu.memory_space<vmem>>, vector<4x8x8xf32>,
      %c0_36 = arith.constant 0 : index
      %c0_37 = arith.constant 0 : index
      %c0_38 = arith.constant 0 : index
      %47 = vector.load %arg7[%c0_36, %c0_37, %c0_38] : memref<4x8x1xf32, #tpu.memory_space<vmem>>, vector<4x8x1xf32>
      tpu.vector_store %arg7[%c0_36, %c0_37, %c0_38], %27 {strides = array<i32>} : memref<4x8x1xf32, #tpu.memory_space<vmem>>, vector<4x8x1xf32>,
    } else {
    }
    %c7_i32_3 = arith.constant 7 : i32
    %9 = arith.addi %1, %c7_i32_3 : i32
    %10 = arith.cmpi sgt, %9, %0 : i32
    %c7_i32_4 = arith.constant 7 : i32
    %11 = arith.addi %0, %c7_i32_4 : i32
    %12 = arith.cmpi sle, %1, %11 : i32
    %13 = arith.andi %10, %12 : i1
    %14 = arith.extui %13 : i1 to i32
    %c0_i32_5 = arith.constant 0 : i32
    %15 = arith.cmpi ne, %14, %c0_i32_5 : i32
    scf.if %15 {
      %c0 = arith.constant 0 : index
      %c0_7 = arith.constant 0 : index
      %c0_8 = arith.constant 0 : index
      %c0_9 = arith.constant 0 : index
      %19 = vector.load %arg3[%c0, %c0_7, %c0_8, %c0_9] : memref<1x4x8x8xf32, #tpu.memory_space<vmem>>, vector<1x4x8x8xf32>
      %20 = vector.shape_cast %19 : vector<1x4x8x8xf32> to vector<4x8x8xf32>
      %c0_10 = arith.constant 0 : index
      %c0_11 = arith.constant 0 : index
      %c0_12 = arith.constant 0 : index
      %c0_13 = arith.constant 0 : index
      %21 = vector.load %arg4[%c0_10, %c0_11, %c0_12, %c0_13] : memref<1x4x8x8xf32, #tpu.memory_space<vmem>>, vector<1x4x8x8xf32>
      %22 = vector.shape_cast %21 : vector<1x4x8x8xf32> to vector<4x8x8xf32>
      "tpu.trace_start"() <{level = 10 : i32, message = "hqd,hkd->hqk"}> : () -> ()
      %cst = arith.constant dense<0.000000e+00> : vector<4x8x8xf32>
      %23 = tpu.matmul %20, %22, %cst {dimension_numbers = #tpu.dot_dimension_numbers<[2], [2], [1], [1], [0, 0, 0, 1, 1, 1], [0], [0]>} : vector<4x8x8xf32>, vector<4x8x8xf32>, vector<4x8x8xf32> -> vector<4x8x8xf32>
      "tpu.trace_stop"() : () -> ()
      %24 = tpu.iota {dimensions = array<i32: 0>} : vector<8x8xi32>
      %25 = vector.broadcast %0 : i32 to vector<8x8xi32>
      %26 = arith.addi %25, %24 : vector<8x8xi32>
      %27 = tpu.iota {dimensions = array<i32: 1>} : vector<8x8xi32>
      %28 = vector.broadcast %1 : i32 to vector<8x8xi32>
      %29 = arith.addi %28, %27 : vector<8x8xi32>
      %30 = arith.cmpi sle, %29, %26 : vector<8x8xi32>
      %cst_14 = arith.constant 0.000000e+00 : f32
      %cst_15 = arith.constant -1.000000e+30 : f32
      %31 = vector.broadcast %cst_14 : f32 to vector<8x8xf32>
      %32 = vector.broadcast %cst_15 : f32 to vector<8x8xf32>
      %33 = arith.select %30, %31, %32 : vector<8x8xi1>, vector<8x8xf32>
      %34 = vector.shape_cast %33 : vector<8x8xf32> to vector<1x8x8xf32>
      %35 = vector.broadcast %34 : vector<1x8x8xf32> to vector<4x8x8xf32>
      %36 = arith.addf %23, %35 : vector<4x8x8xf32>
      %c0_16 = arith.constant 0 : index
      %c0_17 = arith.constant 0 : index
      %c0_18 = arith.constant 0 : index
      %37 = vector.load %arg7[%c0_16, %c0_17, %c0_18] : memref<4x8x1xf32, #tpu.memory_space<vmem>>, vector<4x8x1xf32>
      %cst_19 = arith.constant dense<0xFF800000> : vector<4x8xf32>
      %38 = vector.multi_reduction <maximumf>, %36, %cst_19 [2] : vector<4x8x8xf32> to vector<4x8xf32>
      %39 = vector.shape_cast %38 : vector<4x8xf32> to vector<4x8x1xf32>
      %40 = arith.maximumf %37, %39 : vector<4x8x1xf32>
      %41 = arith.subf %37, %40 : vector<4x8x1xf32>
      %42 = math.exp %41 : vector<4x8x1xf32>
      %43 = vector.broadcast %40 : vector<4x8x1xf32> to vector<4x8x8xf32>
      %44 = arith.subf %36, %43 : vector<4x8x8xf32>
      %45 = math.exp %44 : vector<4x8x8xf32>
      %c0_20 = arith.constant 0 : index
      %c0_21 = arith.constant 0 : index
      %c0_22 = arith.constant 0 : index
      %46 = vector.load %arg8[%c0_20, %c0_21, %c0_22] : memref<4x8x1xf32, #tpu.memory_space<vmem>>, vector<4x8x1xf32>
      %47 = arith.mulf %42, %46 : vector<4x8x1xf32>
      %cst_23 = arith.constant dense<0.000000e+00> : vector<4x8xf32>
      %48 = vector.multi_reduction <add>, %45, %cst_23 [2] : vector<4x8x8xf32> to vector<4x8xf32>
      %49 = vector.shape_cast %48 : vector<4x8xf32> to vector<4x8x1xf32>
      %50 = arith.addf %47, %49 : vector<4x8x1xf32>
      %c0_24 = arith.constant 0 : index
      %c0_25 = arith.constant 0 : index
      %c0_26 = arith.constant 0 : index
      %51 = vector.load %arg8[%c0_24, %c0_25, %c0_26] : memref<4x8x1xf32, #tpu.memory_space<vmem>>, vector<4x8x1xf32>
      tpu.vector_store %arg8[%c0_24, %c0_25, %c0_26], %50 {strides = array<i32>} : memref<4x8x1xf32, #tpu.memory_space<vmem>>, vector<4x8x1xf32>,
      %c0_27 = arith.constant 0 : index
      %c0_28 = arith.constant 0 : index
      %c0_29 = arith.constant 0 : index
      %c0_30 = arith.constant 0 : index
      %52 = vector.load %arg5[%c0_27, %c0_28, %c0_29, %c0_30] : memref<1x4x8x8xf32, #tpu.memory_space<vmem>>, vector<1x4x8x8xf32>
      %53 = vector.shape_cast %52 : vector<1x4x8x8xf32> to vector<4x8x8xf32>
      "tpu.trace_start"() <{level = 10 : i32, message = "hqk,hkd->hqd"}> : () -> ()
      %cst_31 = arith.constant dense<0.000000e+00> : vector<4x8x8xf32>
      %54 = tpu.matmul %45, %53, %cst_31 {dimension_numbers = #tpu.dot_dimension_numbers<[2], [1], [1], [2], [0, 0, 0, 1, 1, 2], [0], [0]>} : vector<4x8x8xf32>, vector<4x8x8xf32>, vector<4x8x8xf32> -> vector<4x8x8xf32>
      "tpu.trace_stop"() : () -> ()
      %c0_32 = arith.constant 0 : index
      %c0_33 = arith.constant 0 : index
      %c0_34 = arith.constant 0 : index
      %55 = vector.load %arg9[%c0_32, %c0_33, %c0_34] : memref<4x8x8xf32, #tpu.memory_space<vmem>>, vector<4x8x8xf32>
      %56 = vector.broadcast %42 : vector<4x8x1xf32> to vector<4x8x8xf32>
      %57 = arith.mulf %56, %55 : vector<4x8x8xf32>
      %58 = arith.addf %57, %54 : vector<4x8x8xf32>
      %c0_35 = arith.constant 0 : index
      %c0_36 = arith.constant 0 : index
      %c0_37 = arith.constant 0 : index
      %59 = vector.load %arg9[%c0_35, %c0_36, %c0_37] : memref<4x8x8xf32, #tpu.memory_space<vmem>>, vector<4x8x8xf32>
      tpu.vector_store %arg9[%c0_35, %c0_36, %c0_37], %58 {strides = array<i32>} : memref<4x8x8xf32, #tpu.memory_space<vmem>>, vector<4x8x8xf32>,
      %c0_38 = arith.constant 0 : index
      %c0_39 = arith.constant 0 : index
      %c0_40 = arith.constant 0 : index
      %60 = vector.load %arg7[%c0_38, %c0_39, %c0_40] : memref<4x8x1xf32, #tpu.memory_space<vmem>>, vector<4x8x1xf32>
      tpu.vector_store %arg7[%c0_38, %c0_39, %c0_40], %40 {strides = array<i32>} : memref<4x8x1xf32, #tpu.memory_space<vmem>>, vector<4x8x1xf32>,
    } else {
    }
    %c1_i32 = arith.constant 1 : i32
    %16 = arith.cmpi eq, %arg2, %c1_i32 : i32
    %17 = arith.extui %16 : i1 to i32
    %c0_i32_6 = arith.constant 0 : i32
    %18 = arith.cmpi ne, %17, %c0_i32_6 : i32
    scf.if %18 {
      %c0 = arith.constant 0 : index
      %c0_7 = arith.constant 0 : index
      %c0_8 = arith.constant 0 : index
      %19 = vector.load %arg8[%c0, %c0_7, %c0_8] : memref<4x8x1xf32, #tpu.memory_space<vmem>>, vector<4x8x1xf32>
      %20 = tpu.reciprocal %19 : vector<4x8x1xf32> -> vector<4x8x1xf32>
      %c0_9 = arith.constant 0 : index
      %c0_10 = arith.constant 0 : index
      %c0_11 = arith.constant 0 : index
      %21 = vector.load %arg9[%c0_9, %c0_10, %c0_11] : memref<4x8x8xf32, #tpu.memory_space<vmem>>, vector<4x8x8xf32>
      %22 = vector.broadcast %20 : vector<4x8x1xf32> to vector<4x8x8xf32>
      %23 = arith.mulf %21, %22 : vector<4x8x8xf32>
      %c0_12 = arith.constant 0 : index
      %c0_13 = arith.constant 0 : index
      %c0_14 = arith.constant 0 : index
      %c0_15 = arith.constant 0 : index
      %24 = vector.load %arg6[%c0_12, %c0_13, %c0_14, %c0_15] : memref<1x4x8x8xf32, #tpu.memory_space<vmem>>, vector<1x4x8x8xf32>
      %25 = vector.shape_cast %24 : vector<1x4x8x8xf32> to vector<4x8x8xf32>
      %26 = vector.shape_cast %23 : vector<4x8x8xf32> to vector<1x4x8x8xf32>
      tpu.vector_store %arg6[%c0_12, %c0_13, %c0_14, %c0_15], %26 {strides = array<i32>} : memref<1x4x8x8xf32, #tpu.memory_space<vmem>>, vector<1x4x8x8xf32>,
    } else {
    }
    return
  }
  func.func @transform_0(%arg0: i32, %arg1: i32, %arg2: i32) -> (i32, i32, i32, i32) {
    %c0_i32 = arith.constant 0 : i32
    %c0_i32_0 = arith.constant 0 : i32
    %c0_i32_1 = arith.constant 0 : i32
    return %arg0, %c0_i32, %arg1, %c0_i32_0 : i32, i32, i32, i32
  }
  func.func @transform_1(%arg0: i32, %arg1: i32, %arg2: i32) -> (i32, i32, i32, i32) {
    %c0_i32 = arith.constant 0 : i32
    %c0_i32_0 = arith.constant 0 : i32
    %c0_i32_1 = arith.constant 0 : i32
    return %arg0, %c0_i32, %arg2, %c0_i32_0 : i32, i32, i32, i32
  }
  func.func @transform_2(%arg0: i32, %arg1: i32, %arg2: i32) -> (i32, i32, i32, i32) {
    %c0_i32 = arith.constant 0 : i32
    %c0_i32_0 = arith.constant 0 : i32
    %c0_i32_1 = arith.constant 0 : i32
    return %arg0, %c0_i32, %arg2, %c0_i32_0 : i32, i32, i32, i32
  }
  func.func @transform_3(%arg0: i32, %arg1: i32, %arg2: i32) -> (i32, i32, i32, i32) {
    %c0_i32 = arith.constant 0 : i32
    %c0_i32_0 = arith.constant 0 : i32
    %c0_i32_1 = arith.constant 0 : i32
    return %arg0, %c0_i32, %arg1, %c0_i32_0 : i32, i32, i32, i32
  }
}

</mosaic_0001>

<bundles_post_ra>
// kernel: tpu_custom_call.1
= control target key start
LH: loop header
LB: loop body
LE: loop exit
PB: predicated region body
PF: predicated region fallthrough
CT: control target
= control target key end

     0   :  { %s2546_s12 = smov 0   ;;  %s2548_s13 = smov 0   ;;  %s2909_s0 = inlined_call_operand.vmem [shape: f32[2,4,16,8], index: 0, kind: input, shape index: {}]   ;;  %s2910_s1 = inlined_call_operand.vmem [shape: f32[2,4,16,8], index: 1, kind: input, shape index: {}]   ;;  %s2911_s2 = inlined_call_operand.vmem [shape: f32[2,4,16,8], index: 2, kind: input, shape index: {}]   ;;  %s2912_s3 = inlined_call_operand.vmem [shape: f32[2,4,16,8], index: 3, kind: output, shape index: {}]  }
   0x1   :  { %s2550_s14 = smov 0   ;;  %s2552_s15 = smov 0  }
   0x2   :  { %s2554_s16 = smov 0   ;;  %s2556_s17 = smov 0  }
   0x3   :  { %s2558_s18 = smov 0   ;;  %s2560_s19 = smov 0  }
   0x4   :  { %s2562_s20 = smov 0   ;;  %s2564_s21 = smov 0  }
   0x5   :  { %s2566_s22 = smov 0  }
   0x6 LB: > { %s25_s23 = sadd.s32 1, %s2502_s19  ;;  %s28_s24 = sadd.s32 1, %s2506_s20  ;;  %s2514_s22 = sphi %s2566_s22, %s13_s22   ;;  %s2510_s21 = sphi %s2564_s21, %s2932_s21   ;;  %s2506_s20 = sphi %s2562_s20, %s2931_s20   ;;  %s2502_s19 = sphi %s2560_s19, %s2930_s19   ;;  %s2498_s18 = sphi %s2558_s18, %s2929_s18   ;;  %s2494_s17 = sphi %s2556_s17, %s2928_s17   ;;  %s2490_s16 = sphi %s2554_s16, %s2927_s16   ;;  %s2486_s15 = sphi %s2552_s15, %s2926_s15   ;;  %s2482_s14 = sphi %s2550_s14, %s2925_s14   ;;  %s2478_s13 = sphi %s2548_s13, %s2924_s13   ;;  %s2474_s12 = sphi %s2546_s12, %s2923_s12  }
   0x7   : > { %p26_p0 = scmp.ge.s32.totalorder %s25_s23, 2  ;;  %p48_p1 = scmp.ne.s32.totalorder %s2486_s15, %s2482_s14 }
   0x8   : > { %p49_p2 = scmp.eq.s32.totalorder %s2514_s22, 0  ;;  %s32_s25 = sadd.s32 1, %s2510_s21 }
   0x9   : > { %s2934_s23 = smov (%p26_p0, %s25_s23), 0  ;;  %s2936_s24 = smov (!%p26_p0, %s28_s24), %s2506_s20 }
   0xa   : > { %p30_p3 = scmp.ge.s32.totalorder %s2936_s24, 2  ;;  %s2120_s26 = sadd.s32 4294967295, %s2514_s22  }
   0xb   : > { %p2614_p4 = por %p49_p2, %p48_p1  ;;  %s65_s28 = ssub.s32 %s2502_s19, %s2934_s23 }
   0xc   : > { %s2938_s24 = smov (%p30_p3, %s2936_s24), 0  ;;  %s2940_s25 = smov (!%p30_p3, %s32_s25), %s2510_s21 }
   0xd   : > { %2916 = sst [smem:[#allocation9_spill]] %s2938_s24  ;;  %p76_p5 = scmp.ne.s32.totalorder %s2478_s13, %s2474_s12 }
   0xe   : > { %p34_p6 = scmp.ge.s32.totalorder %s2940_s25, 2  ;;  %p136_p7 = scmp.eq.s32.totalorder %s2120_s26, 7 }
   0xf   : > { %s37_s29 = ssub.s32 %s2506_s20, %s2938_s24  ;;  %p2627_p8 = por %p76_p5, %p49_p2 }
  0x10   : > { %s2942_s25 = smov (%p34_p6, %s2940_s25), 0  ;;  %s41_s4 = sadd.s32 1, %s2486_s15 }
  0x11   : > { %2918 = sst [smem:[#allocation10_spill]] %s2942_s25  ;;  %p2637_p9 = por %p136_p7, %p48_p1 }
  0x12   : > { %s36_s6 = ssub.s32 %s2510_s21, %s2942_s25  ;;  %s69_s7 = sadd.s32 1, %s2478_s13 }
  0x13   : > { %s38_s8 = sor.u32 %s37_s29, %s36_s6  ;;  %s66_s9 = sor.u32 %s65_s28, %s36_s6 }
  0x14   : > { %p39_p10 = scmp.eq.s32.totalorder %s38_s8, 0  ;;  %p67_p11 = scmp.eq.s32.totalorder %s66_s9, 0 }
  0x15   : > { %p2123_p12 = scmp.ge.s32.totalorder %s2514_s22, 8 }
  0x16   : > { %s2645_s10 = scalar_select %p39_p10, %s2486_s15, %s41_s4  }
  0x17   : > { %s2648_s11 = scalar_select %p67_p11, %s2478_s13, %s69_s7  }
  0x18   : > { %158 = sbr.rel (%p2123_p12) target bundleno = 55 (0x37), region = 16 }
  0x1f   : > { %161 = sbr.rel (!%p2614_p4) target bundleno = 39 (0x27), region = 20  ;;  %s163_s26 = sand.u32 (%p2614_p4), 1, %s2486_s15  }
  0x20   : > { %s2125_s25 = sshll.u32 (%p2614_p4), %s2510_s21, 3  ;;  %s2124_s24 = sshll.u32 (%p2614_p4), %s163_s26, 5 }
  0x21   : > { %s167_s29 = sadd.s32 (%p2614_p4), %s2506_s20, %s2125_s25  ;;  %s165_s7 = scalar_lea.vmem (%p2614_p4), [#allocation5], %s2124_s24 }
  0x22   : > { %s2126_s28 = sshll.u32 (%p2614_p4), %s167_s29, 3 }
  0x23   : > { %s169_s4 = scalar_lea.vmem (%p2614_p4), %s2909_s0, %s2126_s28 }
  0x24   : > { %v203_v0 = vld [vmem:[%s169_s4] sm:$0xff] (%p2614_p4)  ;;  %v205_v1 = vld [vmem:[%s169_s4 + $0x10] sm:$0xff] (%p2614_p4) }
  0x25   : > { %v207_v2 = vld [vmem:[%s169_s4 + $0x20] sm:$0xff] (%p2614_p4)  ;;  %204 = vst [vmem:[%s165_s7] sm:$0xff] (%p2614_p4), %v203_v0  ;;  %206 = vst [vmem:[%s165_s7 + $0x8] sm:$0xff] (%p2614_p4), %v205_v1  ;;  %v209_v3 = vld [vmem:[%s169_s4 + $0x30] sm:$0xff] (%p2614_p4) }
  0x26   : > { %208 = vst [vmem:[%s165_s7 + $0x10] sm:$0xff] %v207_v2  ;;  %210 = vst [vmem:[%s165_s7 + $0x18] sm:$0xff] %v209_v3 }
  0x27 PF: > { %216 = sbr.rel (!%p2627_p8) target bundleno = 47 (0x2f), region = 58  ;;  %s218_s25 = sand.u32 (%p2627_p8), 1, %s2478_s13  }
  0x28   : > { %s2128_s27 = sshll.u32 (%p2627_p8), %s2510_s21, 3  ;;  %s2127_s9 = sshll.u32 (%p2627_p8), %s218_s25, 5 }
  0x29   : > { %s222_s26 = sadd.s32 (%p2627_p8), %s2502_s19, %s2128_s27  ;;  %s220_s8 = scalar_lea.vmem (%p2627_p8), [#allocation6], %s2127_s9 }
  0x2a   : > { %s2129_s29 = sshll.u32 (%p2627_p8), %s222_s26, 3 }
  0x2b   : > { %s224_s24 = scalar_lea.vmem (%p2627_p8), %s2910_s1, %s2129_s29 }
  0x2c   : > { %v258_v4 = vld [vmem:[%s224_s24] sm:$0xff] (%p2627_p8)  ;;  %v260_v5 = vld [vmem:[%s224_s24 + $0x10] sm:$0xff] (%p2627_p8) }
  0x2d   : > { %v262_v6 = vld [vmem:[%s224_s24 + $0x20] sm:$0xff] (%p2627_p8)  ;;  %259 = vst [vmem:[%s220_s8] sm:$0xff] (%p2627_p8), %v258_v4  ;;  %261 = vst [vmem:[%s220_s8 + $0x8] sm:$0xff] (%p2627_p8), %v260_v5  ;;  %v264_v7 = vld [vmem:[%s224_s24 + $0x30] sm:$0xff] (%p2627_p8) }
  0x2e   : > { %263 = vst [vmem:[%s220_s8 + $0x10] sm:$0xff] %v262_v6  ;;  %265 = vst [vmem:[%s220_s8 + $0x18] sm:$0xff] %v264_v7 }
  0x2f PF: > { %271 = sbr.rel (!%p2627_p8) target bundleno = 55 (0x37), region = 96  ;;  %s273_s4 = sand.u32 (%p2627_p8), 1, %s2478_s13  }
  0x30   : > { %s2131_s7 = sshll.u32 (%p2627_p8), %s2510_s21, 3  ;;  %s2130_s25 = sshll.u32 (%p2627_p8), %s273_s4, 5 }
  0x31   : > { %s277_s27 = sadd.s32 (%p2627_p8), %s2502_s19, %s2131_s7  ;;  %s275_s6 = scalar_lea.vmem (%p2627_p8), [#allocation7], %s2130_s25 }
  0x32   : > { %s2132_s26 = sshll.u32 (%p2627_p8), %s277_s27, 3 }
  0x33   : > { %s279_s9 = scalar_lea.vmem (%p2627_p8), %s2911_s2, %s2132_s26 }
  0x34   : > { %v313_v8 = vld [vmem:[%s279_s9] sm:$0xff] (%p2627_p8)  ;;  %v315_v9 = vld [vmem:[%s279_s9 + $0x10] sm:$0xff] (%p2627_p8) }
  0x35   : > { %v317_v10 = vld [vmem:[%s279_s9 + $0x20] sm:$0xff] (%p2627_p8)  ;;  %314 = vst [vmem:[%s275_s6] sm:$0xff] (%p2627_p8), %v313_v8  ;;  %316 = vst [vmem:[%s275_s6 + $0x8] sm:$0xff] (%p2627_p8), %v315_v9  ;;  %v319_v11 = vld [vmem:[%s279_s9 + $0x30] sm:$0xff] (%p2627_p8) }
  0x36   : > { %318 = vst [vmem:[%s275_s6 + $0x10] sm:$0xff] %v317_v10  ;;  %320 = vst [vmem:[%s275_s6 + $0x18] sm:$0xff] %v319_v11 }
  0x37 PF: > { %p2133_p13 = scmp.ge.s32.totalorder %s2514_s22, 1  ;;  %p325_p0 = scmp.lt.s32.totalorder %s2514_s22, 9 }
  0x39   : > { %p326_p1 = pnand %p2133_p13, %p325_p0 }
  0x3a   : > { %s332_s30 = sand.u32 (!%p326_p1), 1, %s2482_s14   ;;  %s339_s24 = sand.u32 (!%p326_p1), 1, %s2474_s12  }
  0x3b   : > { %329 = sbr.rel (%p326_p1) target bundleno = 1702 (0x6a6), region = 134  ;;  %s2134_s8 = sshll.u32 (!%p326_p1), %s332_s30, 5 }
  0x3c   : > { %s2135_s4 = sshll.u32 (!%p326_p1), %s339_s24, 5  ;;  %s2680_s7 = sshll.u32 (!%p326_p1), %s2494_s17, 3 }
  0x3d   : > { %s2683_s25 = sshll.u32 (!%p326_p1), %s2490_s16, 3  ;;  %s2685_s27 = scalar_lea.vmem (!%p326_p1), [#allocation5], %s2134_s8 }
  0x3e   : > { %s2687_s26 = scalar_lea.vmem (!%p326_p1), [#allocation6], %s2135_s4  ;;  %s2689_s29 = scalar_lea.vmem (!%p326_p1), [#allocation7], %s2135_s4 }
  0x3f   : > { %s2691_s28 = scalar_lea.vmem (!%p326_p1), [#allocation8], %s2134_s8  ;;  %p2140_p2 = scmp.ne.s32.totalorder (!%p326_p1), %s2490_s16, 0 }
  0x42   : > { %381 = sbr.rel (%p2140_p2) target bundleno = 73 (0x49), region = 150  ;;  %vm382_vm0 = vcmask (!%p2140_p2), 7168   ;;  %vm391_vm1 = vcmask (!%p2140_p2), 64512   ;;  %v2516_v12 = vmov (!%p2140_p2), -inf   ;;  %v2517_v13 = vmov (!%p2140_p2), 0.0  }
  0x43   : > { %383 = vst.msk [vmem:[#allocation2] sm:$0xff] (!%p2140_p2), %vm382_vm0, %v2516_v12  ;;  %384 = vst.msk [vmem:[#allocation2 + $0x8] sm:$0xff] (!%p2140_p2), %vm382_vm0, %v2516_v12 }
  0x44   : > { %385 = vst.msk [vmem:[#allocation2 + $0x10] sm:$0xff] (!%p2140_p2), %vm382_vm0, %v2516_v12  ;;  %386 = vst.msk [vmem:[#allocation2 + $0x18] sm:$0xff] (!%p2140_p2), %vm382_vm0, %v2516_v12 }
  0x45   : > { %387 = vst.msk [vmem:[#allocation3] sm:$0xff] (!%p2140_p2), %vm382_vm0, %v2517_v13  ;;  %388 = vst.msk [vmem:[#allocation3 + $0x8] sm:$0xff] (!%p2140_p2), %vm382_vm0, %v2517_v13 }
  0x46   : > { %389 = vst.msk [vmem:[#allocation3 + $0x10] sm:$0xff] (!%p2140_p2), %vm382_vm0, %v2517_v13  ;;  %390 = vst.msk [vmem:[#allocation3 + $0x18] sm:$0xff] (!%p2140_p2), %vm382_vm0, %v2517_v13 }
  0x47   : > { %392 = vst.msk [vmem:[#allocation4] sm:$0xff] (!%p2140_p2), %vm391_vm1, %v2517_v13  ;;  %393 = vst.msk [vmem:[#allocation4 + $0x8] sm:$0xff] (!%p2140_p2), %vm391_vm1, %v2517_v13 }
  0x48   : > { %394 = vst.msk [vmem:[#allocation4 + $0x10] sm:$0xff] (!%p2140_p2), %vm391_vm1, %v2517_v13  ;;  %395 = vst.msk [vmem:[#allocation4 + $0x18] sm:$0xff] (!%p2140_p2), %vm391_vm1, %v2517_v13 }
  0x49 PF: > { %s396_s12 = sadd.s32 7, %s2683_s25 }
  0x4a   : > { %p2696_p3 = scmp.gt.s32.totalorder %s396_s12, %s2680_s7 }
  0x4b   : > { %v405_v14 = vld [vmem:[%s2687_s26] sm:$0xff] (!%p2696_p3)  ;;  %vm409_vm2 = vcmask (!%p2696_p3), 64512   ;;  %v406_v15 = vld [vmem:[%s2687_s26 + $0x8] sm:$0xff] (!%p2696_p3)  ;;  %v2518_v16 = vmov (!%p2696_p3), 0.0   ;;  %vm2519_vm3 = vmmov (!%p2696_p3), 0   ;;  %v407_v19 = vld [vmem:[%s2687_s26 + $0x10] sm:$0xff] (!%p2696_p3) }
  0x4c   : > { %400 = sbr.rel (%p2696_p3) target bundleno = 807 (0x327), region = 154  ;;  %2204 = vmatprep.subr.mxu0 (!%p2696_p3), %v2518_v16  ;;  %2206 = vmatprep.mubr.msk.f32.mxu0 (!%p2696_p3), %vm2519_vm3, %v2518_v16  ;;  %v401_v17 = vld [vmem:[%s2685_s27] sm:$0xff] (!%p2696_p3)  ;;  %v402_v18 = vld [vmem:[%s2685_s27 + $0x8] sm:$0xff] (!%p2696_p3)  ;;  %v408_v20 = vld [vmem:[%s2687_s26 + $0x18] sm:$0xff] (!%p2696_p3)  ;;  %v2520_v35 = vmov (!%p2696_p3), 0   ;;  %vm802_vm4 = vcmask (!%p2696_p3), 7168  }
  0x4d   : > { %2205 = vmatpush3.xpose.msk.msra.mxu0 (!%p2696_p3), %vm409_vm2, %v405_v14  ;;  %2209 = vmatprep.subr.mxu1 (!%p2696_p3), %v2518_v16  ;;  %v403_v21 = vld [vmem:[%s2685_s27 + $0x10] sm:$0xff] (!%p2696_p3)  ;;  %v404_v22 = vld [vmem:[%s2685_s27 + $0x18] sm:$0xff] (!%p2696_p3)  ;;  %v714_v36 = vld [vmem:[#allocation2] sm:$0xff] (!%p2696_p3) }
  0x4e   : > { %2210 = vmatpush3.xpose.msk.msra.mxu1 (!%p2696_p3), %vm409_vm2, %v406_v15  ;;  %2211 = vmatprep.mubr.msk.f32.mxu1 (!%p2696_p3), %vm2519_vm3, %v2518_v16  ;;  %v2740_v39 = vld [vmem:[#allocation2 + $0x8] sm:$0xff] (!%p2696_p3)  ;;  %v716_v40 = vld [vmem:[#allocation2 + $0x10] sm:$0xff] (!%p2696_p3)  ;;  %v2744_v47 = vld [vmem:[#allocation2 + $0x18] sm:$0xff] (!%p2696_p3) }
  0x4f   : > { %2214 = vmatprep.subr.mxu0 (!%p2696_p3), %v2518_v16  ;;  %2219 = vmatprep.subr.mxu1 (!%p2696_p3), %v2518_v16  ;;  %v807_v53 = vld [vmem:[%s2689_s29] sm:$0xff] (!%p2696_p3)  ;;  %v808_v55 = vld [vmem:[%s2689_s29 + $0x8] sm:$0xff] (!%p2696_p3)  ;;  %v809_v3 = vld [vmem:[%s2689_s29 + $0x10] sm:$0xff] (!%p2696_p3) }
  0x50   : > { %2207 = vmatmul.mubr.msk.f32.vlgmr.msra.gmra.mrb[0].mxu0 (!%p2696_p3), %vm409_vm2, %v401_v17  ;;  %2382 = vset.pattern.permute.xlu0 (!%p2696_p3), %v2520_v35  ;;  %v810_v7 = vld [vmem:[%s2689_s29 + $0x18] sm:$0xff] (!%p2696_p3) }
  0x51   : > { %2212 = vmatmul.mubr.msk.f32.vlgmr.msra.gmra.mrb[0].mxu1 (!%p2696_p3), %vm409_vm2, %v402_v18  ;;  %2215 = vmatpush3.xpose.msk.msra.mxu0 (!%p2696_p3), %vm409_vm2, %v407_v19 }
  0x52   : > { %2216 = vmatprep.mubr.msk.f32.mxu0 (!%p2696_p3), %vm2519_vm3, %v2518_v16  ;;  %2220 = vmatpush3.xpose.msk.msra.mxu1 (!%p2696_p3), %vm409_vm2, %v408_v20 }
  0x53   : > { %2221 = vmatprep.mubr.msk.f32.mxu1 %vm2519_vm3, %v2518_v16  ;;  %2224 = vmatprep.subr.mxu0 %v2518_v16 }
  0x54   : > { %2217 = vmatmul.mubr.msk.f32.vlgmr.msra.gmra.mrb[2].mxu0 %vm409_vm2, %v403_v21  ;;  %2229 = vmatprep.subr.mxu1 %v2518_v16  ;;  %v778_v21 = vld [vmem:[#allocation3] sm:$0xff] }
  0x55   : > { %2222 = vmatmul.mubr.msk.f32.vlgmr.msra.gmra.mrb[2].mxu1 %vm409_vm2, %v404_v22  ;;  %2226 = vmatprep.mubr.msk.f32.mxu0 %vm2519_vm3, %v2518_v16 }
  0x56   : > { %2231 = vmatprep.mubr.msk.f32.mxu1 %vm2519_vm3, %v2518_v16  ;;  %2383 = vset.pattern.permute.xlu1 %v2520_v35 }
  0x57   : > { %2225 = vmatpush3.msra.mxu0 %v807_v53  ;;  %2230 = vmatpush3.msra.mxu1 %v808_v55 }
  0x58   : > { %2234 = vmatprep.subr.mxu0 %v2518_v16  ;;  %2239 = vmatprep.subr.mxu1 %v2518_v16 }
 0x123   : > { %v482_v23 = vpop.f32.mrb[0].mxu0 }
 0x124   : > { %v2208_v24 = vpop.f32.mrb[1].mxu0  ;;  %v718_v25 = vsel %vm409_vm2, %v482_v23, -inf  ;;  %v558_v26 = vpop.f32.mrb[0].mxu1 }
 0x125   : > { %719 = vmax.xlane.f32.xlu0 %v718_v25  ;;  %v2213_v27 = vpop.f32.mrb[1].mxu1  ;;  %v721_v28 = vsel %vm409_vm2, %v558_v26, -inf  ;;  %v779_v24 = vld [vmem:[#allocation3 + $0x8] sm:$0xff] }
 0x127   : > { %v634_v29 = vpop.f32.mrb[2].mxu0 }
 0x128   : > { %v2218_v30 = vpop.f32.mrb[3].mxu0  ;;  %v724_v31 = vsel %vm409_vm2, %v634_v29, -inf  ;;  %v710_v32 = vpop.f32.mrb[2].mxu1 }
 0x129   : > { %722 = vmax.xlane.f32.xlu0 %v721_v28  ;;  %725 = vmax.xlane.f32.xlu1 %v724_v31  ;;  %v2223_v33 = vpop.f32.mrb[3].mxu1  ;;  %v727_v34 = vsel %vm409_vm2, %v710_v32, -inf  ;;  %v780_v30 = vld [vmem:[#allocation3 + $0x10] sm:$0xff] }
 0x12a   : > { %v781_v33 = vld [vmem:[#allocation3 + $0x18] sm:$0xff] }
 0x12d   : > { %728 = vmax.xlane.f32.xlu1 %v727_v34 }
 0x1b2   : > { %v720_v37 = vpop.xlane.xlu0 %719 }
 0x1b3   : > { %v730_v38 = vmax.f32 %v714_v36, %v720_v37 }
 0x1b5   : > { %v734_v41 = vsub.f32 %v714_v36, %v730_v38  ;;  %1139 = vst.msk [vmem:[#allocation2] sm:$0xff] %vm802_vm4, %v730_v38  ;;  %748 = vperm.xlu0 %2382, %v730_v38   ;;  %v1103_v38 = vld [vmem:[#allocation4] sm:$0xff] }
 0x1b6   : > { %v723_v42 = vpop.xlane.xlu0 %722  ;;  %v726_v43 = vpop.xlane.xlu1 %725 }
 0x1b7   : > { %v738_v44 = vmul.f32 1.442695, %v734_v41  ;;  %v731_v45 = vmax.f32 %v2740_v39, %v723_v42  ;;  %v732_v46 = vmax.f32 %v716_v40, %v726_v43 }
 0x1b9   : > { %2384 = vpow2.f32 %v738_v44  ;;  %v735_v48 = vsub.f32 %v2740_v39, %v731_v45  ;;  %1140 = vst.msk [vmem:[#allocation2 + $0x8] sm:$0xff] %vm802_vm4, %v731_v45  ;;  %753 = vperm.xlu1 %2383, %v731_v45   ;;  %v736_v49 = vsub.f32 %v716_v40, %v732_v46  ;;  %1141 = vst.msk [vmem:[#allocation2 + $0x10] sm:$0xff] %vm802_vm4, %v732_v46  ;;  %v1104_v40 = vld [vmem:[#allocation4 + $0x8] sm:$0xff] }
 0x1ba   : > { %v729_v50 = vpop.xlane.xlu1 %728 }
 0x1bb   : > { %v733_v51 = vmax.f32 %v2744_v47, %v729_v50  ;;  %v742_v9 = vmul.f32 1.442695, %v736_v49  ;;  %v740_v13 = vmul.f32 1.442695, %v735_v48 }
 0x1bd   : > { %758 = vperm.xlu1 %2383, %v732_v46   ;;  %v737_v52 = vsub.f32 %v2744_v47, %v733_v51  ;;  %1142 = vst.msk [vmem:[#allocation2 + $0x18] sm:$0xff] %vm802_vm4, %v733_v51  ;;  %v1105_v46 = vld [vmem:[#allocation4 + $0x10] sm:$0xff] }
 0x1c1   : > { %763 = vperm.xlu1 %2383, %v733_v51   ;;  %v1106_v51 = vld [vmem:[#allocation4 + $0x18] sm:$0xff] }
 0x1c3   : > { %v2385_v54 = vpop.eup %2384 }
 0x1c4   : > { %v782_v22 = vmul.f32 %v2385_v54, %v778_v21 }
 0x1c5   : > { %1109 = vperm.xlu1 %2383, %v2385_v54  }
 0x234   : > { %v749_v56 = vpop.permute.xlu0 %748 }
 0x235   : > { %v766_v57 = vsub.f32 %v482_v23, %v749_v56 }
 0x237   : > { %v770_v58 = vmul.f32 1.442695, %v766_v57 }
 0x238   : > { %v754_v59 = vpop.permute.xlu1 %753 }
 0x239   : > { %2386 = vpow2.f32 %v770_v58  ;;  %v767_v60 = vsub.f32 %v558_v26, %v754_v59 }
 0x23b   : > { %v772_v61 = vmul.f32 1.442695, %v767_v60 }
 0x23c   : > { %v759_v62 = vpop.permute.xlu1 %758 }
 0x23d   : > { %2388 = vpow2.f32 %v772_v61  ;;  %v768_v63 = vsub.f32 %v634_v29, %v759_v62 }
 0x23f   : > { %v774_v0 = vmul.f32 1.442695, %v768_v63 }
 0x240   : > { %v764_v1 = vpop.permute.xlu1 %763 }
 0x241   : > { %2390 = vpow2.f32 %v774_v0  ;;  %v769_v2 = vsub.f32 %v710_v32, %v764_v1 }
 0x243   : > { %v2387_v4 = vpop.eup %2386  ;;  %v776_v5 = vmul.f32 1.442695, %v769_v2 }
 0x244   : > { %2227 = vmatmul.mubr.msk.f32.vlgmr.msra.gmra.mrb[4].mxu0 %vm409_vm2, %v2387_v4  ;;  %v786_v6 = vsel %vm409_vm2, %v2387_v4, 0.0  ;;  %v1110_v20 = vpop.permute.xlu1 %1109 }
 0x245   : > { %2392 = vpow2.f32 %v776_v5  ;;  %787 = vadd.xlane.f32.xlu1 %v786_v6  ;;  %2235 = vmatpush3.msra.mxu0 %v809_v3  ;;  %v1127_v39 = vmul.f32 %v1110_v20, %v1103_v38 }
 0x246   : > { %2236 = vmatprep.mubr.msk.f32.mxu0 %vm2519_vm3, %v2518_v16  ;;  %2394 = vpow2.f32 %v742_v9 }
 0x247   : > { %v2389_v8 = vpop.eup %2388  ;;  %2396 = vpow2.f32 %v740_v13 }
 0x248   : > { %2232 = vmatmul.mubr.msk.f32.vlgmr.msra.gmra.mrb[4].mxu1 %vm409_vm2, %v2389_v8  ;;  %v789_v10 = vsel %vm409_vm2, %v2389_v8, 0.0 }
 0x249   : > { %790 = vadd.xlane.f32.xlu0 %v789_v10  ;;  %2240 = vmatpush3.msra.mxu1 %v810_v7 }
 0x24a   : > { %2241 = vmatprep.mubr.msk.f32.mxu1 %vm2519_vm3, %v2518_v16  ;;  %v744_v16 = vmul.f32 1.442695, %v737_v52 }
 0x24b   : > { %v2391_v11 = vpop.eup %2390 }
 0x24c   : > { %2237 = vmatmul.mubr.msk.f32.vlgmr.msra.gmra.mrb[6].mxu0 %vm409_vm2, %v2391_v11  ;;  %v792_v17 = vsel %vm409_vm2, %v2391_v11, 0.0  ;;  %2398 = vpow2.f32 %v744_v16 }
 0x24f   : > { %v2393_v12 = vpop.eup %2392 }
 0x250   : > { %2242 = vmatmul.mubr.msk.f32.vlgmr.msra.gmra.mrb[6].mxu1 %vm409_vm2, %v2393_v12  ;;  %v2395_v14 = vpop.eup %2394  ;;  %v795_v18 = vsel %vm409_vm2, %v2393_v12, 0.0 }
 0x251   : > { %v2397_v15 = vpop.eup %2396  ;;  %v784_v31 = vmul.f32 %v2395_v14, %v780_v30 }
 0x252   : > { %v783_v26 = vmul.f32 %v2397_v15, %v779_v24 }
 0x256   : > { %1119 = vperm.xlu1 %2383, %v2395_v14   ;;  %v2399_v19 = vpop.eup %2398 }
 0x257   : > { %v785_v35 = vmul.f32 %v2399_v19, %v781_v33 }
 0x25f   : > { %1114 = vperm.xlu0 %2382, %v2397_v15  }
 0x27a   : > { %793 = vadd.xlane.f32.xlu1 %v792_v17 }
 0x27e   : > { %796 = vadd.xlane.f32.xlu1 %v795_v18 }
 0x28f   : > { %1124 = vperm.xlu1 %2383, %v2399_v19  }
 0x2d2   : > { %v788_v23 = vpop.xlane.xlu1 %787 }
 0x2d3   : > { %v798_v25 = vadd.f32 %v788_v23, %v782_v22 }
 0x2d5   : > { %803 = vst.msk [vmem:[#allocation3] sm:$0xff] %vm802_vm4, %v798_v25 }
 0x2d6   : > { %v791_v27 = vpop.xlane.xlu0 %790  ;;  %v1120_v29 = vpop.permute.xlu1 %1119 }
 0x2d7   : > { %v799_v28 = vadd.f32 %v791_v27, %v783_v26  ;;  %v1129_v50 = vmul.f32 %v1120_v29, %v1105_v46 }
 0x2d9   : > { %804 = vst.msk [vmem:[#allocation3 + $0x8] sm:$0xff] %vm802_vm4, %v799_v28 }
 0x2de   : > { %v1115_v41 = vpop.permute.xlu0 %1114 }
 0x2df   : > { %v1128_v45 = vmul.f32 %v1115_v41, %v1104_v40 }
 0x307   : > { %v794_v32 = vpop.xlane.xlu1 %793 }
 0x308   : > { %v800_v34 = vadd.f32 %v794_v32, %v784_v31 }
 0x30a   : > { %805 = vst.msk [vmem:[#allocation3 + $0x10] sm:$0xff] %vm802_vm4, %v800_v34 }
 0x30b   : > { %v797_v36 = vpop.xlane.xlu1 %796 }
 0x30c   : > { %v801_v37 = vadd.f32 %v797_v36, %v785_v35 }
 0x30e   : > { %806 = vst.msk [vmem:[#allocation3 + $0x18] sm:$0xff] %vm802_vm4, %v801_v37 }
 0x30f   : > { %v1125_v52 = vpop.permute.xlu1 %1124 }
 0x310   : > { %v1130_v56 = vmul.f32 %v1125_v52, %v1106_v51 }
 0x317   : > { %v880_v42 = vpop.f32.mrb[4].mxu0 }
 0x318   : > { %v1131_v43 = vadd.f32 %v1127_v39, %v880_v42  ;;  %v2228_v44 = vpop.f32.mrb[5].mxu0 }
 0x31a   : > { %1135 = vst.msk [vmem:[#allocation4] sm:$0xff] %vm409_vm2, %v1131_v43 }
 0x31b   : > { %v953_v47 = vpop.f32.mrb[4].mxu1 }
 0x31c   : > { %v1132_v48 = vadd.f32 %v1128_v45, %v953_v47  ;;  %v2233_v49 = vpop.f32.mrb[5].mxu1 }
 0x31e   : > { %1136 = vst.msk [vmem:[#allocation4 + $0x8] sm:$0xff] %vm409_vm2, %v1132_v48 }
 0x31f   : > { %v1026_v53 = vpop.f32.mrb[6].mxu0 }
 0x320   : > { %v1133_v54 = vadd.f32 %v1129_v50, %v1026_v53  ;;  %v2238_v55 = vpop.f32.mrb[7].mxu0 }
 0x322   : > { %1137 = vst.msk [vmem:[#allocation4 + $0x10] sm:$0xff] %vm409_vm2, %v1133_v54 }
 0x323   : > { %v1099_v57 = vpop.f32.mrb[6].mxu1 }
 0x324   : > { %v1134_v58 = vadd.f32 %v1130_v56, %v1099_v57  ;;  %v2243_v59 = vpop.f32.mrb[7].mxu1 }
 0x326   : > { %1138 = vst.msk [vmem:[#allocation4 + $0x18] sm:$0xff] %vm409_vm2, %v1134_v58 }
 0x327 PF: > { %s1144_s9 = sadd.s32 7, %s2680_s7 }
 0x328   : > { %p1145_p4 = scmp.le.s32.totalorder %s2683_s25, %s1144_s9 }
 0x32a   : > { %p1146_p5 = pnand %p2696_p3, %p1145_p4 }
 0x32b   : > { %v1154_v60 = vld [vmem:[%s2687_s26] sm:$0xff] (!%p1146_p5)  ;;  %vm1168_vm5 = vcmask (!%p1146_p5), 64512   ;;  %v1155_v61 = vld [vmem:[%s2687_s26 + $0x8] sm:$0xff] (!%p1146_p5)  ;;  %v2521_v62 = vmov (!%p1146_p5), 0.0   ;;  %vm2522_vm6 = vmmov (!%p1146_p5), 0   ;;  %v1156_v1 = vld [vmem:[%s2687_s26 + $0x10] sm:$0xff] (!%p1146_p5)  ;;  %v1158_v5 = vlaneseq (!%p1146_p5) }
 0x32c   : > { %1149 = sbr.rel (%p1146_p5) target bundleno = 1545 (0x609), region = 158  ;;  %2244 = vmatprep.subr.mxu0 (!%p1146_p5), %v2521_v62  ;;  %2246 = vmatprep.mubr.msk.f32.mxu0 (!%p1146_p5), %vm2522_vm6, %v2521_v62  ;;  %v1150_v63 = vld [vmem:[%s2685_s27] sm:$0xff] (!%p1146_p5)  ;;  %v1151_v0 = vld [vmem:[%s2685_s27 + $0x8] sm:$0xff] (!%p1146_p5)  ;;  %v1157_v2 = vld [vmem:[%s2687_s26 + $0x18] sm:$0xff] (!%p1146_p5)  ;;  %v1160_v8 = vstv (!%p1146_p5), %s2680_s7  ;;  %v2523_v12 = vmov (!%p1146_p5), -1e+30  }
 0x32d   : > { %2245 = vmatpush3.xpose.msk.msra.mxu0 (!%p1146_p5), %vm1168_vm5, %v1154_v60  ;;  %2249 = vmatprep.subr.mxu1 (!%p1146_p5), %v2521_v62  ;;  %v1152_v3 = vld [vmem:[%s2685_s27 + $0x10] sm:$0xff] (!%p1146_p5)  ;;  %v1153_v4 = vld [vmem:[%s2685_s27 + $0x18] sm:$0xff] (!%p1146_p5)  ;;  %v1159_v6 = vshrl.u32 (!%p1146_p5), %v1158_v5, 7  ;;  %v1163_v7 = vand.u32 (!%p1146_p5), 127, %v1158_v5  ;;  %v1164_v9 = vstv (!%p1146_p5), %s2683_s25  ;;  %v2524_v30 = vmov (!%p1146_p5), 0   ;;  %v1473_v31 = vld [vmem:[#allocation2] sm:$0xff] (!%p1146_p5) }
 0x32e   : > { %2250 = vmatpush3.xpose.msk.msra.mxu1 (!%p1146_p5), %vm1168_vm5, %v1155_v61  ;;  %2251 = vmatprep.mubr.msk.f32.mxu1 (!%p1146_p5), %vm2522_vm6, %v2521_v62  ;;  %vm1561_vm8 = vcmask (!%p1146_p5), 7168   ;;  %v2822_v34 = vld [vmem:[#allocation2 + $0x8] sm:$0xff] (!%p1146_p5)  ;;  %v1475_v35 = vld [vmem:[#allocation2 + $0x10] sm:$0xff] (!%p1146_p5)  ;;  %v2826_v42 = vld [vmem:[#allocation2 + $0x18] sm:$0xff] (!%p1146_p5) }
 0x32f   : > { %2254 = vmatprep.subr.mxu0 (!%p1146_p5), %v2521_v62  ;;  %2259 = vmatprep.subr.mxu1 (!%p1146_p5), %v2521_v62  ;;  %v1161_v10 = vadd.s32 (!%p1146_p5), %v1160_v8, %v1159_v6  ;;  %v1165_v11 = vadd.s32 (!%p1146_p5), %v1164_v9, %v1163_v7  ;;  %v1566_v48 = vld [vmem:[%s2689_s29] sm:$0xff] (!%p1146_p5)  ;;  %v1567_v50 = vld [vmem:[%s2689_s29 + $0x8] sm:$0xff] (!%p1146_p5) }
 0x330   : > { %2247 = vmatmul.mubr.msk.f32.vlgmr.msra.gmra.mrb[0].mxu0 (!%p1146_p5), %vm1168_vm5, %v1150_v63  ;;  %2400 = vset.pattern.permute.xlu0 (!%p1146_p5), %v2524_v30  ;;  %v1568_v63 = vld [vmem:[%s2689_s29 + $0x10] sm:$0xff] (!%p1146_p5) }
 0x331   : > { %2252 = vmatmul.mubr.msk.f32.vlgmr.msra.gmra.mrb[0].mxu1 (!%p1146_p5), %vm1168_vm5, %v1151_v0  ;;  %2255 = vmatpush3.xpose.msk.msra.mxu0 (!%p1146_p5), %vm1168_vm5, %v1156_v1  ;;  %vm1166_vm7 = vcmp.le.s32.totalorder (!%p1146_p5), %v1165_v11, %v1161_v10 }
 0x332   : > { %2256 = vmatprep.mubr.msk.f32.mxu0 (!%p1146_p5), %vm2522_vm6, %v2521_v62  ;;  %2260 = vmatpush3.xpose.msk.msra.mxu1 (!%p1146_p5), %vm1168_vm5, %v1157_v2  ;;  %v1167_v13 = vsel (!%p1146_p5), %vm1166_vm7, 0.0, %v2523_v12 }
 0x333   : > { %2261 = vmatprep.mubr.msk.f32.mxu1 %vm2522_vm6, %v2521_v62  ;;  %2264 = vmatprep.subr.mxu0 %v2521_v62 }
 0x334   : > { %2257 = vmatmul.mubr.msk.f32.vlgmr.msra.gmra.mrb[2].mxu0 %vm1168_vm5, %v1152_v3  ;;  %2269 = vmatprep.subr.mxu1 %v2521_v62  ;;  %v1569_v3 = vld [vmem:[%s2689_s29 + $0x18] sm:$0xff] }
 0x335   : > { %2262 = vmatmul.mubr.msk.f32.vlgmr.msra.gmra.mrb[2].mxu1 %vm1168_vm5, %v1153_v4  ;;  %2266 = vmatprep.mubr.msk.f32.mxu0 %vm2522_vm6, %v2521_v62 }
 0x336   : > { %2271 = vmatprep.mubr.msk.f32.mxu1 %vm2522_vm6, %v2521_v62  ;;  %2401 = vset.pattern.permute.xlu1 %v2524_v30 }
 0x337   : > { %2265 = vmatpush3.msra.mxu0 %v1566_v48  ;;  %2270 = vmatpush3.msra.mxu1 %v1567_v50 }
 0x338   : > { %2274 = vmatprep.subr.mxu0 %v2521_v62  ;;  %2279 = vmatprep.subr.mxu1 %v2521_v62 }
 0x403   : > { %v1241_v14 = vpop.f32.mrb[0].mxu0 }
 0x404   : > { %v1242_v15 = vadd.f32 %v1241_v14, %v1167_v13  ;;  %v2248_v17 = vpop.f32.mrb[1].mxu0  ;;  %v1317_v18 = vpop.f32.mrb[0].mxu1 }
 0x405   : > { %v1318_v16 = vadd.f32 %v1317_v18, %v1167_v13  ;;  %v2253_v19 = vpop.f32.mrb[1].mxu1  ;;  %v1537_v17 = vld [vmem:[#allocation3] sm:$0xff] }
 0x406   : > { %v1477_v20 = vsel %vm1168_vm5, %v1242_v15, -inf  ;;  %v1538_v19 = vld [vmem:[#allocation3 + $0x8] sm:$0xff] }
 0x407   : > { %1478 = vmax.xlane.f32.xlu0 %v1477_v20  ;;  %v1393_v21 = vpop.f32.mrb[2].mxu0  ;;  %v1480_v23 = vsel %vm1168_vm5, %v1318_v16, -inf }
 0x408   : > { %v1394_v22 = vadd.f32 %v1393_v21, %v1167_v13  ;;  %v2258_v24 = vpop.f32.mrb[3].mxu0  ;;  %v1469_v25 = vpop.f32.mrb[2].mxu1 }
 0x409   : > { %v1470_v26 = vadd.f32 %v1469_v25, %v1167_v13  ;;  %v2263_v27 = vpop.f32.mrb[3].mxu1  ;;  %v1539_v25 = vld [vmem:[#allocation3 + $0x10] sm:$0xff] }
 0x40a   : > { %v1483_v28 = vsel %vm1168_vm5, %v1394_v22, -inf }
 0x40b   : > { %1481 = vmax.xlane.f32.xlu0 %v1480_v23  ;;  %1484 = vmax.xlane.f32.xlu1 %v1483_v28  ;;  %v1486_v29 = vsel %vm1168_vm5, %v1470_v26, -inf  ;;  %v1540_v28 = vld [vmem:[#allocation3 + $0x18] sm:$0xff] }
 0x40f   : > { %1487 = vmax.xlane.f32.xlu1 %v1486_v29 }
 0x494   : > { %v1479_v32 = vpop.xlane.xlu0 %1478 }
 0x495   : > { %v1489_v33 = vmax.f32 %v1473_v31, %v1479_v32 }
 0x497   : > { %v1493_v36 = vsub.f32 %v1473_v31, %v1489_v33  ;;  %1898 = vst.msk [vmem:[#allocation2] sm:$0xff] %vm1561_vm8, %v1489_v33  ;;  %1507 = vperm.xlu0 %2400, %v1489_v33   ;;  %v1862_v33 = vld [vmem:[#allocation4] sm:$0xff] }
 0x498   : > { %v1482_v37 = vpop.xlane.xlu0 %1481  ;;  %v1485_v38 = vpop.xlane.xlu1 %1484 }
 0x499   : > { %v1497_v39 = vmul.f32 1.442695, %v1493_v36  ;;  %v1490_v40 = vmax.f32 %v2822_v34, %v1482_v37  ;;  %v1491_v41 = vmax.f32 %v1475_v35, %v1485_v38 }
 0x49b   : > { %2402 = vpow2.f32 %v1497_v39  ;;  %v1494_v43 = vsub.f32 %v2822_v34, %v1490_v40  ;;  %1899 = vst.msk [vmem:[#allocation2 + $0x8] sm:$0xff] %vm1561_vm8, %v1490_v40  ;;  %1512 = vperm.xlu1 %2401, %v1490_v40   ;;  %v1495_v44 = vsub.f32 %v1475_v35, %v1491_v41  ;;  %1900 = vst.msk [vmem:[#allocation2 + $0x10] sm:$0xff] %vm1561_vm8, %v1491_v41  ;;  %v1863_v35 = vld [vmem:[#allocation4 + $0x8] sm:$0xff] }
 0x49c   : > { %v1488_v45 = vpop.xlane.xlu1 %1487 }
 0x49d   : > { %v1492_v46 = vmax.f32 %v2826_v42, %v1488_v45  ;;  %v1501_v5 = vmul.f32 1.442695, %v1495_v44  ;;  %v1499_v9 = vmul.f32 1.442695, %v1494_v43 }
 0x49f   : > { %1517 = vperm.xlu1 %2401, %v1491_v41   ;;  %v1496_v47 = vsub.f32 %v2826_v42, %v1492_v46  ;;  %1901 = vst.msk [vmem:[#allocation2 + $0x18] sm:$0xff] %vm1561_vm8, %v1492_v46  ;;  %v1864_v41 = vld [vmem:[#allocation4 + $0x10] sm:$0xff] }
 0x4a3   : > { %1522 = vperm.xlu1 %2401, %v1492_v46   ;;  %v1865_v46 = vld [vmem:[#allocation4 + $0x18] sm:$0xff] }
 0x4a5   : > { %v2403_v49 = vpop.eup %2402 }
 0x4a6   : > { %v1541_v18 = vmul.f32 %v2403_v49, %v1537_v17 }
 0x4a7   : > { %1868 = vperm.xlu1 %2401, %v2403_v49  }
 0x516   : > { %v1508_v51 = vpop.permute.xlu0 %1507 }
 0x517   : > { %v1525_v52 = vsub.f32 %v1242_v15, %v1508_v51 }
 0x519   : > { %v1529_v53 = vmul.f32 1.442695, %v1525_v52 }
 0x51a   : > { %v1513_v54 = vpop.permute.xlu1 %1512 }
 0x51b   : > { %2404 = vpow2.f32 %v1529_v53  ;;  %v1526_v55 = vsub.f32 %v1318_v16, %v1513_v54 }
 0x51d   : > { %v1531_v56 = vmul.f32 1.442695, %v1526_v55 }
 0x51e   : > { %v1518_v57 = vpop.permute.xlu1 %1517 }
 0x51f   : > { %2406 = vpow2.f32 %v1531_v56  ;;  %v1527_v58 = vsub.f32 %v1394_v22, %v1518_v57 }
 0x521   : > { %v1533_v59 = vmul.f32 1.442695, %v1527_v58 }
 0x522   : > { %v1523_v60 = vpop.permute.xlu1 %1522 }
 0x523   : > { %2408 = vpow2.f32 %v1533_v59  ;;  %v1528_v61 = vsub.f32 %v1470_v26, %v1523_v60 }
 0x525   : > { %v2405_v0 = vpop.eup %2404  ;;  %v1535_v1 = vmul.f32 1.442695, %v1528_v61 }
 0x526   : > { %2267 = vmatmul.mubr.msk.f32.vlgmr.msra.gmra.mrb[4].mxu0 %vm1168_vm5, %v2405_v0  ;;  %v1545_v2 = vsel %vm1168_vm5, %v2405_v0, 0.0  ;;  %v1869_v15 = vpop.permute.xlu1 %1868 }
 0x527   : > { %2410 = vpow2.f32 %v1535_v1  ;;  %1546 = vadd.xlane.f32.xlu1 %v1545_v2  ;;  %2275 = vmatpush3.msra.mxu0 %v1568_v63  ;;  %v1886_v34 = vmul.f32 %v1869_v15, %v1862_v33 }
 0x528   : > { %2276 = vmatprep.mubr.msk.f32.mxu0 %vm2522_vm6, %v2521_v62  ;;  %2412 = vpow2.f32 %v1501_v5 }
 0x529   : > { %v2407_v4 = vpop.eup %2406  ;;  %2414 = vpow2.f32 %v1499_v9 }
 0x52a   : > { %2272 = vmatmul.mubr.msk.f32.vlgmr.msra.gmra.mrb[4].mxu1 %vm1168_vm5, %v2407_v4  ;;  %v1548_v6 = vsel %vm1168_vm5, %v2407_v4, 0.0 }
 0x52b   : > { %1549 = vadd.xlane.f32.xlu0 %v1548_v6  ;;  %2280 = vmatpush3.msra.mxu1 %v1569_v3 }
 0x52c   : > { %2281 = vmatprep.mubr.msk.f32.mxu1 %vm2522_vm6, %v2521_v62  ;;  %v1503_v62 = vmul.f32 1.442695, %v1496_v47 }
 0x52d   : > { %v2409_v7 = vpop.eup %2408 }
 0x52e   : > { %2277 = vmatmul.mubr.msk.f32.vlgmr.msra.gmra.mrb[6].mxu0 %vm1168_vm5, %v2409_v7  ;;  %v1551_v12 = vsel %vm1168_vm5, %v2409_v7, 0.0  ;;  %2416 = vpow2.f32 %v1503_v62 }
 0x531   : > { %v2411_v8 = vpop.eup %2410 }
 0x532   : > { %2282 = vmatmul.mubr.msk.f32.vlgmr.msra.gmra.mrb[6].mxu1 %vm1168_vm5, %v2411_v8  ;;  %v2413_v10 = vpop.eup %2412  ;;  %v1554_v13 = vsel %vm1168_vm5, %v2411_v8, 0.0 }
 0x533   : > { %v2415_v11 = vpop.eup %2414  ;;  %v1543_v26 = vmul.f32 %v2413_v10, %v1539_v25 }
 0x534   : > { %v1542_v21 = vmul.f32 %v2415_v11, %v1538_v19 }
 0x538   : > { %1878 = vperm.xlu1 %2401, %v2413_v10   ;;  %v2417_v14 = vpop.eup %2416 }
 0x539   : > { %v1544_v30 = vmul.f32 %v2417_v14, %v1540_v28 }
 0x541   : > { %1873 = vperm.xlu0 %2400, %v2415_v11  }
 0x55c   : > { %1552 = vadd.xlane.f32.xlu1 %v1551_v12 }
 0x560   : > { %1555 = vadd.xlane.f32.xlu1 %v1554_v13 }
 0x571   : > { %1883 = vperm.xlu1 %2401, %v2417_v14  }
 0x5b4   : > { %v1547_v16 = vpop.xlane.xlu1 %1546 }
 0x5b5   : > { %v1557_v20 = vadd.f32 %v1547_v16, %v1541_v18 }
 0x5b7   : > { %1562 = vst.msk [vmem:[#allocation3] sm:$0xff] %vm1561_vm8, %v1557_v20 }
 0x5b8   : > { %v1550_v22 = vpop.xlane.xlu0 %1549  ;;  %v1879_v24 = vpop.permute.xlu1 %1878 }
 0x5b9   : > { %v1558_v23 = vadd.f32 %v1550_v22, %v1542_v21  ;;  %v1888_v45 = vmul.f32 %v1879_v24, %v1864_v41 }
 0x5bb   : > { %1563 = vst.msk [vmem:[#allocation3 + $0x8] sm:$0xff] %vm1561_vm8, %v1558_v23 }
 0x5c0   : > { %v1874_v36 = vpop.permute.xlu0 %1873 }
 0x5c1   : > { %v1887_v40 = vmul.f32 %v1874_v36, %v1863_v35 }
 0x5e9   : > { %v1553_v27 = vpop.xlane.xlu1 %1552 }
 0x5ea   : > { %v1559_v29 = vadd.f32 %v1553_v27, %v1543_v26 }
 0x5ec   : > { %1564 = vst.msk [vmem:[#allocation3 + $0x10] sm:$0xff] %vm1561_vm8, %v1559_v29 }
 0x5ed   : > { %v1556_v31 = vpop.xlane.xlu1 %1555 }
 0x5ee   : > { %v1560_v32 = vadd.f32 %v1556_v31, %v1544_v30 }
 0x5f0   : > { %1565 = vst.msk [vmem:[#allocation3 + $0x18] sm:$0xff] %vm1561_vm8, %v1560_v32 }
 0x5f1   : > { %v1884_v47 = vpop.permute.xlu1 %1883 }
 0x5f2   : > { %v1889_v51 = vmul.f32 %v1884_v47, %v1865_v46 }
 0x5f9   : > { %v1639_v37 = vpop.f32.mrb[4].mxu0 }
 0x5fa   : > { %v1890_v38 = vadd.f32 %v1886_v34, %v1639_v37  ;;  %v2268_v39 = vpop.f32.mrb[5].mxu0 }
 0x5fc   : > { %1894 = vst.msk [vmem:[#allocation4] sm:$0xff] %vm1168_vm5, %v1890_v38 }
 0x5fd   : > { %v1712_v42 = vpop.f32.mrb[4].mxu1 }
 0x5fe   : > { %v1891_v43 = vadd.f32 %v1887_v40, %v1712_v42  ;;  %v2273_v44 = vpop.f32.mrb[5].mxu1 }
 0x600   : > { %1895 = vst.msk [vmem:[#allocation4 + $0x8] sm:$0xff] %vm1168_vm5, %v1891_v43 }
 0x601   : > { %v1785_v48 = vpop.f32.mrb[6].mxu0 }
 0x602   : > { %v1892_v49 = vadd.f32 %v1888_v45, %v1785_v48  ;;  %v2278_v50 = vpop.f32.mrb[7].mxu0 }
 0x604   : > { %1896 = vst.msk [vmem:[#allocation4 + $0x10] sm:$0xff] %vm1168_vm5, %v1892_v49 }
 0x605   : > { %v1858_v52 = vpop.f32.mrb[6].mxu1 }
 0x606   : > { %v1893_v53 = vadd.f32 %v1889_v51, %v1858_v52  ;;  %v2283_v54 = vpop.f32.mrb[7].mxu1 }
 0x608   : > { %1897 = vst.msk [vmem:[#allocation4 + $0x18] sm:$0xff] %vm1168_vm5, %v1893_v53 }
 0x609 PF: > { %p2166_p6 = scmp.ne.s32.totalorder %s2490_s16, 1 }
 0x60a   : > { %v1908_v55 = vld [vmem:[#allocation3 + $0x10] sm:$0xff] (!%p2166_p6)  ;;  %v1906_v56 = vld [vmem:[#allocation3] sm:$0xff] (!%p2166_p6)  ;;  %v1909_v57 = vld [vmem:[#allocation3 + $0x18] sm:$0xff] (!%p2166_p6)  ;;  %v2525_v58 = vmov (!%p2166_p6), 0   ;;  %vm1942_vm9 = vcmask (!%p2166_p6), 64512  }
 0x60b   : > { %1905 = sbr.rel (%p2166_p6) target bundleno = 1694 (0x69e), region = 162  ;;  %2419 = vset.pattern.permute.xlu1 (!%p2166_p6), %v2525_v58  ;;  %2418 = vset.pattern.permute.xlu0 (!%p2166_p6), %v2525_v58  ;;  %2420 = vrcp.f32 (!%p2166_p6), %v1908_v55  ;;  %v1907_v59 = vld [vmem:[#allocation3 + $0x8] sm:$0xff] (!%p2166_p6)  ;;  %v1916_v1 = vld [vmem:[#allocation4 + $0x10] sm:$0xff] (!%p2166_p6)  ;;  %v1914_v2 = vld [vmem:[#allocation4] sm:$0xff] (!%p2166_p6) }
 0x60c   : > { %2422 = vrcp.f32 (!%p2166_p6), %v1906_v56  ;;  %v1915_v8 = vld [vmem:[#allocation4 + $0x8] sm:$0xff] (!%p2166_p6) }
 0x60d   : > { %2424 = vrcp.f32 (!%p2166_p6), %v1909_v57 }
 0x60e   : > { %2426 = vrcp.f32 (!%p2166_p6), %v1907_v59 }
 0x60f   : > { %v1917_v7 = vld [vmem:[#allocation4 + $0x18] sm:$0xff] (!%p2166_p6) }
 0x615   : > { %v2421_v60 = vpop.eup %2420 }
 0x616   : > { %v2423_v61 = vpop.eup %2422  ;;  %1930 = vperm.xlu1 %2419, %v2421_v60  }
 0x617   : > { %v2425_v63 = vpop.eup %2424  ;;  %1920 = vperm.xlu0 %2418, %v2423_v61  }
 0x618   : > { %v2427_v0 = vpop.eup %2426 }
 0x61a   : > { %1935 = vperm.xlu1 %2419, %v2425_v63  }
 0x61b   : > { %1925 = vperm.xlu0 %2418, %v2427_v0  }
 0x695   : > { %v1931_v3 = vpop.permute.xlu1 %1930 }
 0x696   : > { %v1940_v4 = vmul.f32 %v1931_v3, %v1916_v1  ;;  %v1921_v5 = vpop.permute.xlu0 %1920 }
 0x697   : > { %v1938_v6 = vmul.f32 %v1921_v5, %v1914_v2 }
 0x698   : > { %1945 = vst.msk [vmem:[%s2691_s28 + $0x10] sm:$0xff] %vm1942_vm9, %v1940_v4 }
 0x699   : > { %1943 = vst.msk [vmem:[%s2691_s28] sm:$0xff] %vm1942_vm9, %v1938_v6  ;;  %v1936_v9 = vpop.permute.xlu1 %1935 }
 0x69a   : > { %v1941_v10 = vmul.f32 %v1936_v9, %v1917_v7  ;;  %v1926_v11 = vpop.permute.xlu0 %1925 }
 0x69b   : > { %v1939_v12 = vmul.f32 %v1926_v11, %v1915_v8 }
 0x69c   : > { %1946 = vst.msk [vmem:[%s2691_s28 + $0x18] sm:$0xff] %vm1942_vm9, %v1941_v10 }
 0x69d   : > { %1944 = vst.msk [vmem:[%s2691_s28 + $0x8] sm:$0xff] %vm1942_vm9, %v1939_v12 }
 0x69e PF: > { %1953 = sbr.rel (!%p2637_p9) target bundleno = 1702 (0x6a6), region = 166  ;;  %s2168_s16 = sshll.u32 (%p2637_p9), %s2498_s18, 3 }
 0x69f   : > { %s1955_s6 = sadd.s32 (%p2637_p9), %s2494_s17, %s2168_s16  ;;  %v1995_v14 = vld [vmem:[%s2691_s28 + $0x10] sm:$0xff] (%p2637_p9) }
 0x6a0   : > { %v1991_v13 = vld [vmem:[%s2691_s28] sm:$0xff] (%p2637_p9)  ;;  %s2169_s30 = sshll.u32 (%p2637_p9), %s1955_s6, 3 }
 0x6a1   : > { %s1957_s4 = scalar_lea.vmem (%p2637_p9), %s2912_s3, %s2169_s30 }
 0x6a2   : > { %1992 = vst [vmem:[%s1957_s4] sm:$0xff] (%p2637_p9), %v1991_v13  ;;  %1996 = vst [vmem:[%s1957_s4 + $0x20] sm:$0xff] (%p2637_p9), %v1995_v14 }
 0x6a3   : > { %v1997_v15 = vld [vmem:[%s2691_s28 + $0x18] sm:$0xff] (%p2637_p9) }
 0x6a4   : > { %v1993_v62 = vld [vmem:[%s2691_s28 + $0x8] sm:$0xff] (%p2637_p9)  ;;  %1998 = vst [vmem:[%s1957_s4 + $0x30] sm:$0xff] (%p2637_p9), %v1997_v15 }
 0x6a5   : > { %1994 = vst [vmem:[%s1957_s4 + $0x10] sm:$0xff] %v1993_v62 }
 0x6a6 PF: > { %s13_s22 = sadd.s32 1, %s2514_s22   ;;  %s2921_s5 = sld [smem:[#allocation9_spill]] }
 0x6a7   : > { %p10_p7 = scmp.ge.s32.totalorder %s13_s22, 10   ;;  %s2922_s7 = sld [smem:[#allocation10_spill]] }
 0x6a8   : > { %s2923_s12 = smov %s2478_s13  ;;  %s2924_s13 = smov %s2648_s11 }
 0x6a9   : > { %s2925_s14 = smov %s2486_s15  ;;  %s2926_s15 = smov %s2645_s10 }
 0x6aa   : > { %s2927_s16 = smov %s2502_s19  ;;  %s2928_s17 = smov %s2506_s20 }
 0x6ab   : > { %s2929_s18 = smov %s2510_s21  ;;  %s2930_s19 = smov %s2934_s23 }
 0x6ac   : > { %s2931_s20 = smov %s2921_s5  ;;  %12 = sbr.rel (!%p10_p7) target bundleno = 6 (0x6), region = 251 }
 0x6ad   : > { %s2932_s21 = smov %s2922_s7 }

</bundles_post_ra>
